<compile_context>
chip_gen: v5e
topology: v5e:2x2
jax: 0.10.0
libtpu: 0.0.40
codegen_flags: <defaults>
</compile_context>

<pallas_src>
import functools

import jax
import jax.numpy as jnp
from jax.experimental import pallas as pl
from jax.experimental.pallas import tpu as pltpu


def _round_up(v, m):
    return (v + m - 1) // m * m


def _choose_tiles(nr, t_out, itemsize, target_bytes):
    """Pick (rows_per_block, time_per_block)."""
    # Time tile: whole lane-dense output width unless the audio is very long;
    # 64Ki samples keeps an 8-row f32 block at 2 MiB (fits v7x VMEM budget).
    t_blk = min(t_out, 64 * 1024)                      # multiple of 128
    if nr <= 8:
        return nr, t_blk                               # full row dim is legal
    rows = max(8, (target_bytes // max(1, t_blk * itemsize)) // 8 * 8)
    # Keep at least two row blocks so the "parallel" axis can span v7x's 2 TCs.
    rows = min(rows, _round_up(pl.cdiv(nr, 2), 8))
    return int(rows), int(t_blk)


def _pad_kernel(len_ref, x_ref, o_ref, *, t_in_blk, t_blk):
    # len_ref: (R, 1) int32   effective (clamped) length per flattened row
    # x_ref:   (R, t_in_blk)  input storage tile
    # o_ref:   (R, t_blk)     lane-dense output tile
    j = pl.program_id(1)                               # time-block index
    x = x_ref[...]                                     # single load
    t = j * t_blk + jax.lax.broadcasted_iota(jnp.int32, x.shape, 1)
    masked = jnp.where(t < len_ref[...], x, jnp.zeros((), x.dtype))
    if t_in_blk == t_blk:                              # static branch
        o_ref[...] = masked
    else:
        # storage narrower than one output tile: zero the tail in-kernel
        o_ref[:, :t_in_blk] = masked
        o_ref[:, t_in_blk:] = jnp.zeros(
            (o_ref.shape[0], t_blk - t_in_blk), o_ref.dtype)


def pad_to_max_duration(x, lengths, max_duration, *,
                        target_block_bytes=2 << 20):
    """x: (B, C, T_store) padded-batch storage, lengths: (B,) int.
    Returns (B, C, max_duration): per-sample truncate / right-zero-pad."""
    B, C, T_store = x.shape
    max_duration = int(max_duration)
    nr = B * C
    itemsize = jnp.dtype(x.dtype).itemsize

    t_out = _round_up(max_duration, 128)               # lane-dense output width
    r_blk, t_blk = _choose_tiles(nr, t_out, itemsize, target_block_bytes)
    grid = (pl.cdiv(nr, r_blk), pl.cdiv(t_out, t_blk))

    # (B, C, T) -> (B*C, T): contiguous / free; removes C<8 sublane waste.
    x2 = x.reshape(nr, T_store)
    row_len = jnp.repeat(
        jnp.minimum(lengths.astype(jnp.int32), max_duration), C
    ).reshape(nr, 1)

    if T_store >= t_blk:
        t_in_blk = t_blk
        n_in_t = pl.cdiv(T_store, t_blk)
        # Clamp: time blocks past the stored data re-read the last valid input
        # block; the (t < length) mask zeroes everything there anyway.
        x_index = lambda r, j: (r, jnp.minimum(j, n_in_t - 1))
    else:
        t_in_blk = T_store                             # full (ragged) time dim
        x_index = lambda r, j: (r, 0)

    kernel = functools.partial(_pad_kernel, t_in_blk=t_in_blk, t_blk=t_blk)

    block_bytes = r_blk * t_blk * itemsize
    vmem_limit = int(min(64 << 20, max(32 << 20, 8 * block_bytes)))

    out2 = pl.pallas_call(
        kernel,
        out_shape=jax.ShapeDtypeStruct((nr, t_out), x.dtype),
        grid_spec=pltpu.PrefetchScalarGridSpec(
            num_scalar_prefetch=0,
            grid=grid,
            in_specs=[
                pl.BlockSpec((r_blk, 1), lambda r, j: (r, 0)),     # lengths col
                pl.BlockSpec((r_blk, t_in_blk), x_index),          # storage
            ],
            out_specs=pl.BlockSpec((r_blk, t_blk), lambda r, j: (r, j)),
        ),
        compiler_params=pltpu.CompilerParams(
            dimension_semantics=("parallel", "parallel"),
            vmem_limit_bytes=vmem_limit,
        ),
    )(row_len, x2)

    out = out2.reshape(B, C, t_out)
    if t_out != max_duration:
        # Only when max_duration isn't 128-aligned; kernel stores stay lane-dense.
        out = out[:, :, :max_duration]
    return out
    # TODO(synk): optional input_output_aliases fast path (zero only the tails
    # in place) when T_store == max_duration and in-place update is acceptable.


def _reference(x, lengths, max_duration):
    B, C, T = x.shape
    if T >= max_duration:
        xs = x[:, :, :max_duration]
    else:
        xs = jnp.pad(x, ((0, 0), (0, 0), (0, max_duration - T)))
    t = jnp.arange(max_duration)[None, None, :]
    eff = jnp.minimum(lengths.astype(jnp.int32), max_duration)[:, None, None]
    return jnp.where(t < eff, xs, jnp.zeros((), x.dtype))


if __name__ == "__main__":
    key = jax.random.PRNGKey(0)
    cases = [
        # (B, C, T_store, max_duration, lengths)
        (4, 4, 320, 256, jnp.array([100, 256, 300, 320], jnp.int32)),  # trunc+pad
        (2, 4, 200, 384, jnp.array([150, 200], jnp.int32)),            # pure pad
        (2, 4, 180, 150, jnp.array([90, 180], jnp.int32)),             # non-128 max
    ]
    for i, (B, C, T_store, max_dur, lengths) in enumerate(cases):
        key, sub = jax.random.split(key)
        x = jax.random.normal(sub, (B, C, T_store), dtype=jnp.float32)
        out = jax.block_until_ready(pad_to_max_duration(x, lengths, max_dur))
        ref = _reference(x, lengths, max_dur)
        assert out.shape == (B, C, max_dur), (i, out.shape)
        assert jnp.allclose(out, ref), f"case {i}: mismatch vs reference"
    print("KERNEL_OK")
</pallas_src>

<mosaic_0001>
module attributes {stable_mosaic.version = 11 : i64} {
  func.func @_pad_kernel(%arg0: i32, %arg1: i32, %arg2: memref<8x1xi32, #tpu.memory_space<vmem>>, %arg3: memref<8x256xf32, #tpu.memory_space<vmem>>, %arg4: memref<8x256xf32, #tpu.memory_space<vmem>>) attributes {dimension_semantics = [#tpu.dimension_semantics<parallel>, #tpu.dimension_semantics<parallel>], iteration_bounds = array<i64: 2, 1>, scalar_prefetch = 0 : i64, scratch_operands = 0 : i64, tpu.core_type = #tpu.core_type<tc>, window_params = [{transform_indices = @transform_0, window_bounds = array<i64: 8, 1>}, {transform_indices = @transform_1, window_bounds = array<i64: 8, 256>}, {transform_indices = @transform_2, window_bounds = array<i64: 8, 256>}]} {
    %c0 = arith.constant 0 : index
    %c0_0 = arith.constant 0 : index
    %0 = vector.load %arg3[%c0, %c0_0] : memref<8x256xf32, #tpu.memory_space<vmem>>, vector<8x256xf32>
    %c256_i32 = arith.constant 256 : i32
    %1 = arith.muli %arg1, %c256_i32 : i32
    %2 = tpu.iota {dimensions = array<i32: 1>} : vector<8x256xi32>
    %3 = vector.broadcast %1 : i32 to vector<8x256xi32>
    %4 = arith.addi %3, %2 : vector<8x256xi32>
    %c0_1 = arith.constant 0 : index
    %c0_2 = arith.constant 0 : index
    %5 = vector.load %arg2[%c0_1, %c0_2] : memref<8x1xi32, #tpu.memory_space<vmem>>, vector<8x1xi32>
    %6 = vector.broadcast %5 : vector<8x1xi32> to vector<8x256xi32>
    %7 = arith.cmpi slt, %4, %6 : vector<8x256xi32>
    %cst = arith.constant 0.000000e+00 : f32
    %8 = vector.broadcast %cst : f32 to vector<8x256xf32>
    %9 = arith.select %7, %0, %8 : vector<8x256xi1>, vector<8x256xf32>
    %c0_3 = arith.constant 0 : index
    %c0_4 = arith.constant 0 : index
    %10 = vector.load %arg4[%c0_3, %c0_4] : memref<8x256xf32, #tpu.memory_space<vmem>>, vector<8x256xf32>
    tpu.vector_store %arg4[%c0_3, %c0_4], %9 {strides = array<i32>} : memref<8x256xf32, #tpu.memory_space<vmem>>, vector<8x256xf32>,
    return
  }
  func.func @transform_0(%arg0: i32, %arg1: i32) -> (i32, i32) {
    %c0_i32 = arith.constant 0 : i32
    %c0_i32_0 = arith.constant 0 : i32
    return %arg0, %c0_i32 : i32, i32
  }
  func.func @transform_1(%arg0: i32, %arg1: i32) -> (i32, i32) {
    %c1_i32 = arith.constant 1 : i32
    %0 = arith.minsi %arg1, %c1_i32 : i32
    %c0_i32 = arith.constant 0 : i32
    return %arg0, %0 : i32, i32
  }
  func.func @transform_2(%arg0: i32, %arg1: i32) -> (i32, i32) {
    %c0_i32 = arith.constant 0 : i32
    return %arg0, %arg1 : i32, i32
  }
}

</mosaic_0001>

<bundles_post_ra>
// kernel: tpu_custom_call.1
= control target key start
LH: loop header
LB: loop body
LE: loop exit
PB: predicated region body
PF: predicated region fallthrough
CT: control target
= control target key end

     0   :  { %7 = vsyncpa [#allocation3], 0  ;;  %s688_s0 = inlined_call_operand.vmem [shape: s32[16,1], index: 0, kind: input, shape index: {}]   ;;  %s689_s1 = inlined_call_operand.hbm [shape: f32[16,320], index: 1, kind: input, shape index: {}]   ;;  %s690_s2 = inlined_call_operand.hbm [shape: f32[16,256], index: 2, kind: output, shape index: {}]  }
   0x1   :  { %9 = vsyncpa [#allocation3 + $0x1], 0 }
   0x2   :  { %10 = vsyncpa [#allocation4], 0 }
   0x3   :  { %12 = vsyncpa [#allocation4 + $0x1], 0  ;;  %s563_s9 = smov 0   ;;  %s565_s10 = smov 0  }
   0x4   :  { %s567_s11 = smov 0   ;;  %s569_s12 = smov 0  }
   0x5   :  { %s571_s13 = smov 0   ;;  %s573_s14 = smov 0  }
   0x6 LB: > { %s352_s15 = sadd.s32 4294967295, %s545_s14   ;;  %s353_s16 = sadd.s32 4294967294, %s545_s14   ;;  %s545_s14 = sphi %s573_s14, %s18_s14   ;;  %s541_s13 = sphi %s571_s13, %s699_s13   ;;  %s537_s12 = sphi %s569_s12, %s698_s12   ;;  %s533_s11 = sphi %s567_s11, %s697_s11   ;;  %s529_s10 = sphi %s565_s10, %s696_s10   ;;  %s525_s9 = sphi %s563_s9, %s695_s9  }
   0x7   : > { %s30_s17 = sadd.s32 1, %s541_s13  ;;  %s69_s18 = sadd.s32 1, %s533_s11 }
   0x8   : > { %p32_p0 = scmp.ge.s32.totalorder %s30_s17, 2  ;;  %p76_p1 = scmp.ne.s32.totalorder %s533_s11, %s529_s10 }
   0x9   : > { %p77_p2 = scmp.eq.s32.totalorder %s545_s14, 0  ;;  %p82_p3 = scmp.ne.s32.totalorder %s529_s10, %s525_s9 }
   0xa   : > { %s701_s17 = smov (%p32_p0, %s30_s17), 0  ;;  %p83_p5 = scmp.eq.s32.totalorder %s352_s15, 0 }
   0xb   : > { %p604_p4 = por %p77_p2, %p76_p1  ;;  %s64_s20 = ssub.s32 %s541_s13, %s701_s17 }
   0xc   : > { %p108_p6 = scmp.eq.s32.totalorder %s352_s15, 1  ;;  %p67_p7 = scmp.eq.s32.totalorder %s64_s20, 0 }
   0xd   : > { %p610_p8 = por %p83_p5, %p82_p3  ;;  %p114_p10 = scmp.eq.s32.totalorder %s353_s16, 1 }
   0xe   : > { %p614_p9 = por %p108_p6, %p76_p1  ;;  %p355_p12 = scmp.ge.s32.totalorder %s545_s14, 2 }
   0xf   : > { %s619_s23 = scalar_select %p67_p7, %s533_s11, %s69_s18  }
  0x10   : > { %p621_p11 = por %p114_p10, %p82_p3  ;;  %p381_p13 = scmp.lt.s32.totalorder %s545_s14, 2 }
  0x11   : > { %s141_s25 = sand.u32 1, %s533_s11   ;;  %s368_s27 = smul.u32 24, %s541_s13 }
  0x12   : > { %s356_s26 = sshll.u32 %s141_s25, 4  ;;  %p374_p0 = pnand %p381_p13, %p604_p4 }
  0x13   : > { %s145_s28 = scalar_lea.vmem [#allocation2], %s356_s26  ;;  %s160_s4 = scalar_lea.hbm %s689_s1, %s368_s27 }
  0x14   : > { %s165_s29 = sshll.u32 %s145_s28, 4  ;;  %s163_s5 = sshll.u32 %s160_s4, 4  ;;  %s166_s29 = int_to_ptr.vmem [resolvable:$true] %s165_s29  ;;  %s164_s5 = int_to_ptr.hbm [resolvable:$true] %s163_s5 }
  0x15   : > { %p358_p1 = scmp.ge.s32.totalorder %s545_s14, 1  ;;  %s142_s6 = scalar_lea.sflag [#allocation3], %s141_s25 }
  0x16   : > { %376 = dma.hbm_to_vmem [thread:$0]  (!%p374_p0), %s164_s5, 256, %s166_s29, %s142_s6  }
  0x17   : > { %p170_p2 = scmp.lt.s32.totalorder %s545_s14, 3 }
  0x19   : > { %p171_p3 = pnand %p358_p1, %p170_p2 }
  0x1a   : > { %s637_s7 = sand.u32 (!%p171_p3), 1, %s529_s10  }
  0x1b   : > { %174 = sbr.rel (%p171_p3) target bundleno = 161 (0xa1), region = 28  ;;  %s359_s8 = sshll.u32 (!%p171_p3), %s637_s7, 4 }
  0x1c   : > { %s177_s15 = scalar_lea.sflag (!%p171_p3), [#allocation3], %s637_s7  ;;  %s180_s16 = scalar_lea.vmem (!%p171_p3), [#allocation2], %s359_s8 }
  0x20   : > { %516 = dma.done.wait (%p610_p8), %s177_s15, 256  }
  0x21   : > { %518 = vsyncadd (%p610_p8), %s177_s15, 4294967040  ;;  %p206_p4 = scmp.lt.s32.totalorder %s537_s12, 1  ;;  %v547_v0 = vmov 0   ;;  %v221_v2 = vlaneseq  ;;  %s367_s27 = sshll.u32 %s537_s12, 4  ;;  %v218_v5 = vld [vmem:[%s180_s16] sm:$0xff]  ;;  %v219_v6 = vld [vmem:[%s180_s16 + $0x8] sm:$0xff] }
  0x22   : > { %432 = vset.pattern.permute.xlu0 %v547_v0  ;;  %s251_s29 = scalar_lea.hbm %s690_s2, %s367_s27  ;;  %s205_s30 = scalar_lea.vmem [#allocation5], %s359_s8 }
  0x23   : > { %s207_s18 = scalar_select %p206_p4, %s537_s12, 1  ;;  %v222_v3 = vand.u32 127, %v221_v2 }
  0x24   : > { %s253_s3 = sshll.u32 %s205_s30, 4  ;;  %s255_s4 = sshll.u32 %s251_s29, 4  ;;  %s254_s3 = int_to_ptr.vmem [resolvable:$true] %s253_s3  ;;  %s256_s4 = int_to_ptr.hbm [resolvable:$true] %s255_s4 }
  0x25   : > { %s361_s19 = sshll.u32 %s207_s18, 3  ;;  %v223_v4 = vadd.s32 128, %v222_v3  ;;  %s238_s12 = scalar_lea.sflag [#allocation4], %s637_s7 }
  0x26   : > { %s209_s26 = scalar_lea.vmem %s688_s0, %s361_s19  ;;  %s477_s5 = sshra.s32 %s256_s4, 4  ;;  %s478_s5 = int_to_ptr.hbm [resolvable:$true] %s477_s5 }
  0x27   : > { %v227_v1 = vld [vmem:[%s209_s26] sm:$0xff]  ;;  %s479_s6 = scalar_lea.hbm %s478_s5, 16  ;;  %s483_s16 = scalar_lea.hbm %s690_s2, 32 }
  0x28   : > { %229 = vperm.xlu0 %432, %v227_v1   ;;  %p480_p5 = scmp.ne.s32.totalorder %s478_s5, %s479_s6  ;;  %p484_p8 = scmp.lt.s32.totalorder %s478_s5, %s690_s2 }
  0x29   : > { %p485_p10 = scmp.lt.s32.totalorder %s483_s16, %s479_s6 }
  0x2a   : > { %p481_p6 = pnand %p480_p5, %p614_p9 }
  0x2b   : > { %p486_p13 = por %p485_p10, %p484_p8 }
  0x2c   : > { %p482_p7 = pneg %p481_p6 }
  0x2e   : > { %p487_p0 = pnand %p486_p13, %p482_p7 }
  0x9a   : > { %v230_v7 = vpop.permute.xlu0 %229 }
  0x9b   : > { %vm231_vm0 = vcmp.lt.s32.totalorder %v222_v3, %v230_v7  ;;  %vm232_vm1 = vcmp.lt.s32.totalorder %v223_v4, %v230_v7 }
  0x9c   : > { %v233_v8 = vsel %vm231_vm0, %v218_v5, 0.0  ;;  %v234_v9 = vsel %vm232_vm1, %v219_v6, 0.0 }
  0x9d   : > { %235 = vst [vmem:[%s205_s30] sm:$0xff] %v233_v8 }
  0x9e   : > { %236 = vst [vmem:[%s205_s30 + $0x8] sm:$0xff] %v234_v9 }
  0x9f   : > { %490 = shalt.err (!%p487_p0)
}
  0xa0   : > { %371 = dma.vmem_to_hbm [thread:$0]  (%p614_p9), %s254_s3, 256, %s256_s4, %s238_s12  }
  0xa1 PF: > { %s267_s7 = sand.u32 1, %s525_s9   ;;  %p378_p1 = pnand %p355_p12, %p621_p11 }
  0xa2   : > { %s268_s20 = scalar_lea.sflag [#allocation4], %s267_s7 }
  0xa3   : > { %p379_p2 = pneg %p378_p1 }
  0xa5   : > { %520 = dma.done.wait (%p379_p2), %s268_s20, 256  }
  0xa6   : > { %522 = vsyncadd (%p379_p2), %s268_s20, 4294967040  ;;  %s18_s14 = sadd.s32 1, %s545_s14   ;;  %s695_s9 = smov %s529_s10 }
  0xa7   : > { %p15_p3 = scmp.ge.s32.totalorder %s18_s14, 4   ;;  %s696_s10 = smov %s533_s11 }
  0xa8   : > { %s697_s11 = smov %s619_s23  ;;  %s698_s12 = smov %s541_s13 }
  0xa9   : > { %s699_s13 = smov %s701_s17  ;;  %17 = sbr.rel (!%p15_p3) target bundleno = 6 (0x6), region = 76 }
  0xae   :  { %274 = vsyncpa [#allocation3], 1 }
  0xaf   :  { %276 = vsyncpa [#allocation3 + $0x1], 1 }
  0xb0   :  { %277 = vsyncpa [#allocation4], 1 }
  0xb1   :  { %279 = vsyncpa [#allocation4 + $0x1], 1 }

</bundles_post_ra>
